<compile_context>
chip_gen: v6e
topology: v6e:2x2x1
jax: 0.10.0
libtpu: 0.0.40
codegen_flags: <defaults>
</compile_context>

<pallas_src>
import functools

import jax
import jax.numpy as jnp
from jax.experimental import pallas as pl
from jax.experimental.pallas import tpu as pltpu

SUBLANE = 8  # vreg sublane count


def _round_up(x, m):
    return (x + m - 1) // m * m


# ---------------------------------------------------------------------------
# Pallas kernel: fused  y = GELU(x @ W1 + b1) @ W2 + b2  over a tile of points
# ---------------------------------------------------------------------------
def _point_mlp_kernel(x_ref, w1_ref, b1_ref, w2_ref, b2_ref, o_ref, *, approximate):
    # First linear: f32 MXU accumulation.
    x = x_ref[...].astype(jnp.float32)
    h = jnp.dot(x, w1_ref[...], preferred_element_type=jnp.float32)
    h = h + b1_ref[...]                                    # broadcast (1, H)
    if approximate:
        # tanh-approx GELU: a single EUP push in an otherwise idle slot (v5e).
        c = jnp.float32(0.7978845608028654)                # sqrt(2/pi)
        h = 0.5 * h * (1.0 + jnp.tanh(c * (h + 0.044715 * h * h * h)))
    else:
        # exact erf GELU (torch.nn.GELU() default), f32 math.
        h = 0.5 * h * (1.0 + jax.lax.erf(h * jnp.float32(0.7071067811865476)))
    # Second linear.
    y = jnp.dot(h.astype(w2_ref.dtype), w2_ref[...], preferred_element_type=jnp.float32)
    y = y + b2_ref[...]                                    # broadcast (1, C_out)
    o_ref[...] = y.astype(o_ref.dtype)


def point_mlp_pallas(feat, w1, b1, w2, b2, *, tile_n=1024, approximate_gelu=False):
    """Fused Linear->GELU->Linear over per-point features.

    feat: [N, C_in]   w1: [C_in, H]  b1: [H] or [1,H]   w2: [H, C_out]  b2: [C_out] or [1,C_out]
    Returns [N, C_out] in feat.dtype, with no wrapper-side pad/cast/slice passes.
    """
    N, C_in = feat.shape
    H = w1.shape[-1]
    C_out = w2.shape[-1]

    # Biases as (1, C) rows for in-kernel broadcast (no-op if already 2D).
    b1r = jnp.reshape(b1.astype(jnp.float32), (1, H))
    b2r = jnp.reshape(b2.astype(jnp.float32), (1, C_out))

    # ---- tile selection: big tiles amortize ~0.35us/grid-step, but keep
    # >= 4 grid steps when possible (>= 2 per TensorCore on v7x) so each
    # core's x/out DMAs double-buffer against compute.
    tile_n = max(SUBLANE, min(int(tile_n), _round_up(pl.cdiv(N, 4), SUBLANE)))
    grid = (pl.cdiv(N, tile_n),)   # edge block (if any) is masked by Pallas

    # ---- explicit VMEM budget: streamed x/out (double-buffered), resident
    # weights/biases, and the f32 intermediate h plus its cast copy.
    fbytes = jnp.dtype(feat.dtype).itemsize
    wbytes = jnp.dtype(w1.dtype).itemsize
    stream_bytes = 2 * tile_n * (C_in + C_out) * fbytes
    resident_bytes = (C_in * H + H * C_out) * wbytes + 4 * (H + C_out)
    scratch_bytes = 2 * tile_n * H * 4          # h (f32) + cast copy for 2nd matmul
    vmem_limit = int(min(max(2 * (stream_bytes + resident_bytes + scratch_bytes),
                             16 << 20), 48 << 20))

    kernel = functools.partial(_point_mlp_kernel, approximate=approximate_gelu)

    return pl.pallas_call(
        kernel,
        out_shape=jax.ShapeDtypeStruct((N, C_out), feat.dtype),
        grid_spec=pltpu.PrefetchScalarGridSpec(
            num_scalar_prefetch=0,
            grid=grid,
            in_specs=[
                pl.BlockSpec((tile_n, C_in), lambda i: (i, 0)),   # x   (streamed)
                pl.BlockSpec((C_in, H), lambda i: (0, 0)),        # W1  (resident)
                pl.BlockSpec((1, H), lambda i: (0, 0)),           # b1  (resident)
                pl.BlockSpec((H, C_out), lambda i: (0, 0)),       # W2  (resident)
                pl.BlockSpec((1, C_out), lambda i: (0, 0)),       # b2  (resident)
            ],
            out_specs=pl.BlockSpec((tile_n, C_out), lambda i: (i, 0)),
        ),
        compiler_params=pltpu.CompilerParams(
            dimension_semantics=("parallel",),
            vmem_limit_bytes=vmem_limit,
        ),
    )(feat, w1, b1r, w2, b2r)


# ---------------------------------------------------------------------------
# Minimal JAX-side Point container + PointSequential mirroring the torch API
# ---------------------------------------------------------------------------
class Point(dict):
    """Minimal JAX mirror of Pointcept's Point dict (feat / batch / offset)."""

    def __init__(self, *args, **kwargs):
        super().__init__(*args, **kwargs)
        if "batch" not in self and "offset" in self:
            self["batch"] = offset2batch(self["offset"])
        elif "offset" not in self and "batch" in self:
            self["offset"] = batch2offset(self["batch"])

    def __getattr__(self, name):
        try:
            return self[name]
        except KeyError as e:
            raise AttributeError(name) from e

    def __setattr__(self, name, value):
        self[name] = value


def batch2offset(batch):
    counts = jnp.bincount(batch)
    return jnp.cumsum(counts).astype(jnp.int32)


def offset2batch(offset, total=None):
    bincount = jnp.diff(offset, prepend=jnp.zeros((1,), dtype=offset.dtype))
    if total is None:
        total = int(offset[-1])   # eager only; pass static `total` under jit
    return jnp.repeat(jnp.arange(bincount.shape[0], dtype=jnp.int32), bincount,
                      total_repeat_length=total)


class PointSequentialPallas:
    """PointSequential(Linear(C_in,H), GELU(), Linear(H,C_out)) with the whole
    per-point chain fused into one Pallas kernel.  Forward semantics match the
    torch container: non-PointModule layers act on `point.feat` in order."""

    def __init__(self, c_in, hidden, c_out, key):
        k1, k2, k3, k4 = jax.random.split(key, 4)
        # torch.nn.Linear init: U(-1/sqrt(fan_in), 1/sqrt(fan_in)); weights are
        # stored already transposed to [in, out] for the kernel; biases stored
        # pre-reshaped to (1, C) so no per-forward prep pass is needed.
        lim1 = 1.0 / jnp.sqrt(jnp.float32(c_in))
        lim2 = 1.0 / jnp.sqrt(jnp.float32(hidden))
        self.w1 = jax.random.uniform(k1, (c_in, hidden), jnp.float32, -lim1, lim1)
        self.b1 = jax.random.uniform(k2, (1, hidden), jnp.float32, -lim1, lim1)
        self.w2 = jax.random.uniform(k3, (hidden, c_out), jnp.float32, -lim2, lim2)
        self.b2 = jax.random.uniform(k4, (1, c_out), jnp.float32, -lim2, lim2)
        # TODO(synk): spconv.SparseConvTensor branches of PointSequential.forward
        # (sparse 3D conv) and the z-order/Hilbert serialization helpers have no
        # clean dense-Pallas equivalent and are omitted.

    def __call__(self, point: Point) -> Point:
        point.feat = point_mlp_pallas(point.feat, self.w1, self.b1, self.w2, self.b2)
        return point

    # pure-JAX f32 reference (HIGHEST precision) for correctness checking
    def reference(self, feat):
        h = jnp.dot(feat, self.w1, precision=jax.lax.Precision.HIGHEST) + self.b1
        h = 0.5 * h * (1.0 + jax.lax.erf(h * jnp.float32(0.7071067811865476)))
        y = jnp.dot(h, self.w2, precision=jax.lax.Precision.HIGHEST) + self.b2
        return y


# ---------------------------------------------------------------------------
if __name__ == "__main__":
    key = jax.random.PRNGKey(0)
    k_feat, k_params = jax.random.split(key)

    # Small batched point cloud: 2 batches of 128 points each, 32-dim features.
    N, C_IN, HIDDEN, C_OUT = 256, 32, 64, 32
    feat = jax.random.normal(k_feat, (N, C_IN), dtype=jnp.float32)
    offset = jnp.array([128, 256], dtype=jnp.int32)

    point = Point(feat=feat, offset=offset)
    model = PointSequentialPallas(C_IN, HIDDEN, C_OUT, k_params)

    out_point = model(point)
    out = jax.block_until_ready(out_point.feat)
    assert out.shape == (N, C_OUT)
    assert out.dtype == feat.dtype

    ref = model.reference(feat)
    assert jnp.allclose(out, ref, atol=2e-2, rtol=2e-2), "mismatch vs f32 reference"

    print("KERNEL_OK")
</pallas_src>

<mosaic_0001>
module attributes {stable_mosaic.version = 11 : i64} {
  func.func @_point_mlp_kernel(%arg0: i32, %arg1: memref<64x32xf32, #tpu.memory_space<vmem>>, %arg2: memref<32x64xf32, #tpu.memory_space<vmem>>, %arg3: memref<1x64xf32, #tpu.memory_space<vmem>>, %arg4: memref<64x32xf32, #tpu.memory_space<vmem>>, %arg5: memref<1x32xf32, #tpu.memory_space<vmem>>, %arg6: memref<64x32xf32, #tpu.memory_space<vmem>>) attributes {dimension_semantics = [#tpu.dimension_semantics<parallel>], iteration_bounds = array<i64: 4>, scalar_prefetch = 0 : i64, scratch_operands = 0 : i64, tpu.core_type = #tpu.core_type<tc>, window_params = [{transform_indices = @transform_0, window_bounds = array<i64: 64, 32>}, {pipeline_mode = #tpu.pipeline_mode<synchronous>, transform_indices = @transform_1, window_bounds = array<i64: 32, 64>}, {pipeline_mode = #tpu.pipeline_mode<synchronous>, transform_indices = @transform_2, window_bounds = array<i64: 1, 64>}, {pipeline_mode = #tpu.pipeline_mode<synchronous>, transform_indices = @transform_3, window_bounds = array<i64: 64, 32>}, {pipeline_mode = #tpu.pipeline_mode<synchronous>, transform_indices = @transform_4, window_bounds = array<i64: 1, 32>}, {transform_indices = @transform_5, window_bounds = array<i64: 64, 32>}]} {
    %c0 = arith.constant 0 : index
    %c0_0 = arith.constant 0 : index
    %0 = vector.load %arg1[%c0, %c0_0] : memref<64x32xf32, #tpu.memory_space<vmem>>, vector<64x32xf32>
    %c0_1 = arith.constant 0 : index
    %c0_2 = arith.constant 0 : index
    %1 = vector.load %arg2[%c0_1, %c0_2] : memref<32x64xf32, #tpu.memory_space<vmem>>, vector<32x64xf32>
    %cst = arith.constant dense<0.000000e+00> : vector<64x64xf32>
    %2 = tpu.matmul %0, %1, %cst {dimension_numbers = #tpu.dot_dimension_numbers<[1], [0], [0], [1], [0, 0, 1, 1], [], []>} : vector<64x32xf32>, vector<32x64xf32>, vector<64x64xf32> -> vector<64x64xf32>
    %c0_3 = arith.constant 0 : index
    %c0_4 = arith.constant 0 : index
    %3 = vector.load %arg3[%c0_3, %c0_4] : memref<1x64xf32, #tpu.memory_space<vmem>>, vector<1x64xf32>
    %4 = vector.broadcast %3 : vector<1x64xf32> to vector<64x64xf32>
    %5 = arith.addf %2, %4 : vector<64x64xf32>
    %cst_5 = arith.constant 5.000000e-01 : f32
    %6 = vector.broadcast %cst_5 : f32 to vector<64x64xf32>
    %7 = arith.mulf %6, %5 : vector<64x64xf32>
    %cst_6 = arith.constant 0.707106769 : f32
    %8 = vector.broadcast %cst_6 : f32 to vector<64x64xf32>
    %9 = arith.mulf %5, %8 : vector<64x64xf32>
    %10 = math.erf %9 : vector<64x64xf32>
    %cst_7 = arith.constant 1.000000e+00 : f32
    %11 = vector.broadcast %cst_7 : f32 to vector<64x64xf32>
    %12 = arith.addf %11, %10 : vector<64x64xf32>
    %13 = arith.mulf %7, %12 : vector<64x64xf32>
    %c0_8 = arith.constant 0 : index
    %c0_9 = arith.constant 0 : index
    %14 = vector.load %arg4[%c0_8, %c0_9] : memref<64x32xf32, #tpu.memory_space<vmem>>, vector<64x32xf32>
    %cst_10 = arith.constant dense<0.000000e+00> : vector<64x32xf32>
    %15 = tpu.matmul %13, %14, %cst_10 {dimension_numbers = #tpu.dot_dimension_numbers<[1], [0], [0], [1], [0, 0, 1, 1], [], []>} : vector<64x64xf32>, vector<64x32xf32>, vector<64x32xf32> -> vector<64x32xf32>
    %c0_11 = arith.constant 0 : index
    %c0_12 = arith.constant 0 : index
    %16 = vector.load %arg5[%c0_11, %c0_12] : memref<1x32xf32, #tpu.memory_space<vmem>>, vector<1x32xf32>
    %17 = vector.broadcast %16 : vector<1x32xf32> to vector<64x32xf32>
    %18 = arith.addf %15, %17 : vector<64x32xf32>
    %c0_13 = arith.constant 0 : index
    %c0_14 = arith.constant 0 : index
    %19 = vector.load %arg6[%c0_13, %c0_14] : memref<64x32xf32, #tpu.memory_space<vmem>>, vector<64x32xf32>
    tpu.vector_store %arg6[%c0_13, %c0_14], %18 {strides = array<i32>} : memref<64x32xf32, #tpu.memory_space<vmem>>, vector<64x32xf32>,
    return
  }
  func.func @transform_0(%arg0: i32) -> (i32, i32) {
    %c0_i32 = arith.constant 0 : i32
    %c0_i32_0 = arith.constant 0 : i32
    return %arg0, %c0_i32 : i32, i32
  }
  func.func @transform_1(%arg0: i32) -> (i32, i32) {
    %c0_i32 = arith.constant 0 : i32
    %c0_i32_0 = arith.constant 0 : i32
    %c0_i32_1 = arith.constant 0 : i32
    return %c0_i32, %c0_i32_0 : i32, i32
  }
  func.func @transform_2(%arg0: i32) -> (i32, i32) {
    %c0_i32 = arith.constant 0 : i32
    %c0_i32_0 = arith.constant 0 : i32
    %c0_i32_1 = arith.constant 0 : i32
    return %c0_i32, %c0_i32_0 : i32, i32
  }
  func.func @transform_3(%arg0: i32) -> (i32, i32) {
    %c0_i32 = arith.constant 0 : i32
    %c0_i32_0 = arith.constant 0 : i32
    %c0_i32_1 = arith.constant 0 : i32
    return %c0_i32, %c0_i32_0 : i32, i32
  }
  func.func @transform_4(%arg0: i32) -> (i32, i32) {
    %c0_i32 = arith.constant 0 : i32
    %c0_i32_0 = arith.constant 0 : i32
    %c0_i32_1 = arith.constant 0 : i32
    return %c0_i32, %c0_i32_0 : i32, i32
  }
  func.func @transform_5(%arg0: i32) -> (i32, i32) {
    %c0_i32 = arith.constant 0 : i32
    %c0_i32_0 = arith.constant 0 : i32
    return %arg0, %c0_i32 : i32, i32
  }
}

</mosaic_0001>

<bundles_post_ra>
// kernel: tpu_custom_call.1
= control target key start
LH: loop header
LB: loop body
LE: loop exit
PB: predicated region body
PF: predicated region fallthrough
CT: control target
= control target key end

     0   :  { %s809_s18 = smov 0   ;;  %s899_s0 = inlined_call_operand.vmem [shape: f32[256,32], index: 0, kind: input, shape index: {}]   ;;  %s900_s1 = inlined_call_operand.vmem [shape: f32[32,64], index: 1, kind: input, shape index: {}]   ;;  %s901_s2 = inlined_call_operand.vmem [shape: f32[1,64], index: 2, kind: input, shape index: {}]   ;;  %s902_s3 = inlined_call_operand.vmem [shape: f32[64,32], index: 3, kind: input, shape index: {}]   ;;  %s903_s4 = inlined_call_operand.vmem [shape: f32[1,32], index: 4, kind: input, shape index: {}]   ;;  %s904_s5 = inlined_call_operand.vmem [shape: f32[256,32], index: 5, kind: output, shape index: {}]  }
   0x1 LB: > { %s626_s19 = sadd.s32 4294967295, %s777_s18   ;;  %p630_p0 = scmp.ge.s32.totalorder %s777_s18, 1  ;;  %s777_s18 = sphi %s809_s18, %s15_s18  }
   0x2   : > { %p188_p1 = scmp.lt.s32.totalorder %s777_s18, 5 }
   0x4   : > { %p189_p2 = pnand %p630_p0, %p188_p1 }
   0x5   : > { %s631_s24 = sshll.u32 (!%p189_p2), %s626_s19, 3 }
   0x6   : > { %192 = sbr.rel (%p189_p2) target bundleno = 448 (0x1c0), region = 40  ;;  %p217_p3 = scmp.lt.s32.totalorder (!%p189_p2), %s631_s24, 31 }
   0xb   : > { %v239_v0 = vld [vmem:[%s900_s1 + $0x18] sm:$0xff]  ;;  %v238_v1 = vld [vmem:[%s900_s1 + $0x10] sm:$0xff]  ;;  %v237_v2 = vld [vmem:[%s900_s1 + $0x8] sm:$0xff]  ;;  %s906_s24 = smov (!%p217_p3, %s631_s24), 31  ;;  %vm247_vm0 = vcmask 261120   ;;  %vm432_vm1 = vcmask 523264  }
   0xc   : > { %683 = vmatprep.subr.mxu0 %v239_v0  ;;  %v236_v3 = vld [vmem:[%s900_s1] sm:$0xff]  ;;  %s632_s29 = sshll.u32 %s906_s24, 3  ;;  %v424_v12 = vld [vmem:[%s902_s3 + $0x38] sm:$0xff]  ;;  %v423_v13 = vld [vmem:[%s902_s3 + $0x30] sm:$0xff] }
   0xd   : > { %684 = vmatpush3.msra.mxu0 %v239_v0  ;;  %s220_s7 = scalar_lea.vmem %s899_s0, %s632_s29  ;;  %731 = vmatprep.subr.mxu1 %v424_v12  ;;  %v422_v14 = vld [vmem:[%s902_s3 + $0x28] sm:$0xff]  ;;  %v421_v15 = vld [vmem:[%s902_s3 + $0x20] sm:$0xff]  ;;  %v420_v16 = vld [vmem:[%s902_s3 + $0x18] sm:$0xff]  ;;  %s226_s8 = scalar_lea.vmem %s904_s5, %s632_s29 }
   0xe   : > { %685 = vmatprep.subr.mxu0 %v238_v1  ;;  %v228_v4 = vld [vmem:[%s220_s7] sm:$0xff]  ;;  %v229_v5 = vld [vmem:[%s220_s7 + $0x8] sm:$0xff]  ;;  %v230_v6 = vld [vmem:[%s220_s7 + $0x10] sm:$0xff]  ;;  %739 = vmatpush3.msra.mxu1 %v424_v12 }
   0xf   : > { %686 = vmatpush3.msra.mxu0 %v238_v1  ;;  %691 = vmatprep.mubr.msk.f32.mxu0 %vm247_vm0, %v228_v4  ;;  %v231_v7 = vld [vmem:[%s220_s7 + $0x18] sm:$0xff]  ;;  %v232_v8 = vld [vmem:[%s220_s7 + $0x20] sm:$0xff]  ;;  %v233_v9 = vld [vmem:[%s220_s7 + $0x28] sm:$0xff] }
  0x10   : > { %687 = vmatprep.subr.mxu0 %v237_v2  ;;  %v234_v10 = vld [vmem:[%s220_s7 + $0x30] sm:$0xff]  ;;  %v235_v11 = vld [vmem:[%s220_s7 + $0x38] sm:$0xff]  ;;  %732 = vmatprep.subr.mxu1 %v423_v13  ;;  %v418_v18 = vld [vmem:[%s902_s3 + $0x8] sm:$0xff] }
  0x11   : > { %688 = vmatpush3.msra.mxu0 %v237_v2  ;;  %740 = vmatpush3.msra.mxu1 %v423_v13  ;;  %v419_v17 = vld [vmem:[%s902_s3 + $0x10] sm:$0xff]  ;;  %v417_v19 = vld [vmem:[%s902_s3] sm:$0xff] }
  0x12   : > { %689 = vmatprep.subr.mxu0 %v236_v3  ;;  %733 = vmatprep.subr.mxu1 %v422_v14  ;;  %v635_v20 = vld [vmem:[%s901_s2] ss:$0 sm:$0xff] }
  0x13   : > { %690 = vmatpush3.msra.mxu0 %v236_v3  ;;  %741 = vmatpush3.msra.mxu1 %v422_v14 }
  0x14   : > { %692 = vmatmul.mubr.msk.f32.vlgmr.msra.gmra.mxu0 %vm247_vm0, %v229_v5  ;;  %703 = vmatprep.subr.mxu0 %v424_v12 }
  0x15   : > { %694 = vmatprep.mubr.msk.f32.mxu0 %vm247_vm0, %v230_v6  ;;  %704 = vmatpush3.msra.mxu0 %v424_v12 }
  0x16   : > { %705 = vmatprep.subr.mxu0 %v423_v13  ;;  %734 = vmatprep.subr.mxu1 %v421_v15 }
  0x17   : > { %706 = vmatpush3.msra.mxu0 %v423_v13  ;;  %742 = vmatpush3.msra.mxu1 %v421_v15  ;;  %v644_v13 = vld [vmem:[%s903_s4] ss:$0 sm:$0xff] }
  0x18   : > { %695 = vmatmul.mubr.msk.f32.gmra.mxu0 %vm247_vm0, %v231_v7  ;;  %707 = vmatprep.subr.mxu0 %v422_v14 }
  0x19   : > { %697 = vmatprep.mubr.msk.f32.mxu0 %vm247_vm0, %v232_v8  ;;  %708 = vmatpush3.msra.mxu0 %v422_v14 }
  0x1a   : > { %709 = vmatprep.subr.mxu0 %v421_v15  ;;  %735 = vmatprep.subr.mxu1 %v420_v16 }
  0x1b   : > { %710 = vmatpush3.msra.mxu0 %v421_v15  ;;  %743 = vmatpush3.msra.mxu1 %v420_v16 }
  0x1c   : > { %698 = vmatmul.mubr.msk.f32.gmra.mxu0 %vm247_vm0, %v233_v9  ;;  %711 = vmatprep.subr.mxu0 %v420_v16 }
  0x1d   : > { %700 = vmatprep.mubr.msk.f32.mxu0 %vm247_vm0, %v234_v10  ;;  %712 = vmatpush3.msra.mxu0 %v420_v16 }
  0x1e   : > { %713 = vmatprep.subr.mxu0 %v419_v17  ;;  %736 = vmatprep.subr.mxu1 %v419_v17 }
  0x1f   : > { %714 = vmatpush3.msra.mxu0 %v419_v17  ;;  %744 = vmatpush3.msra.mxu1 %v419_v17 }
  0x20   : > { %701 = vmatmul.mubr.msk.f32.gmra.mxu0 %vm247_vm0, %v235_v11  ;;  %715 = vmatprep.subr.mxu0 %v418_v18 }
  0x21   : > { %737 = vmatprep.subr.mxu1 %v418_v18  ;;  %716 = vmatpush3.msra.mxu0 %v418_v18 }
  0x22   : > { %745 = vmatpush3.msra.mxu1 %v418_v18  ;;  %717 = vmatprep.subr.mxu0 %v417_v19 }
  0x23   : > { %738 = vmatprep.subr.mxu1 %v417_v19  ;;  %718 = vmatpush3.msra.mxu0 %v417_v19 }
  0x24   : > { %746 = vmatpush3.msra.mxu1 %v417_v19 }
  0xd4   : > { %v693_v21 = vpop.f32.mrf.mxu0 }
  0xd5   : > { %v344_v22 = vadd.f32 %v693_v21, %v635_v20 }
  0xd6   : > { %v338_v23 = vpop.f32.mrf.mxu0 }
  0xd7   : > { %v386_v24 = vmul.f32 0.70710677, %v344_v22  ;;  %v339_v25 = vadd.f32 %v635_v20, %v338_v23  ;;  %v378_v51 = vmul.f32 0.5, %v344_v22 }
  0xd8   : > { %v696_v26 = vpop.f32.mrf.mxu0 }
  0xd9   : > { %755 = verf.f32 %v386_v24  ;;  %v385_v27 = vmul.f32 0.70710677, %v339_v25  ;;  %v354_v28 = vadd.f32 %v696_v26, %v635_v20  ;;  %v377_v48 = vmul.f32 0.5, %v339_v25 }
  0xda   : > { %v348_v29 = vpop.f32.mrf.mxu0 }
  0xdb   : > { %757 = verf.f32 %v385_v27  ;;  %v388_v30 = vmul.f32 0.70710677, %v354_v28  ;;  %v349_v31 = vadd.f32 %v635_v20, %v348_v29  ;;  %v380_v59 = vmul.f32 0.5, %v354_v28 }
  0xdc   : > { %v699_v32 = vpop.f32.mrf.mxu0 }
  0xdd   : > { %759 = verf.f32 %v388_v30  ;;  %v387_v33 = vmul.f32 0.70710677, %v349_v31  ;;  %v364_v34 = vadd.f32 %v699_v32, %v635_v20  ;;  %v379_v56 = vmul.f32 0.5, %v349_v31 }
  0xde   : > { %v358_v35 = vpop.f32.mrf.mxu0 }
  0xdf   : > { %761 = verf.f32 %v387_v33  ;;  %v390_v36 = vmul.f32 0.70710677, %v364_v34  ;;  %v359_v37 = vadd.f32 %v635_v20, %v358_v35  ;;  %v382_v3 = vmul.f32 0.5, %v364_v34 }
  0xe0   : > { %v702_v38 = vpop.f32.mrf.mxu0 }
  0xe1   : > { %763 = verf.f32 %v390_v36  ;;  %v389_v39 = vmul.f32 0.70710677, %v359_v37  ;;  %v374_v40 = vadd.f32 %v702_v38, %v635_v20  ;;  %v381_v0 = vmul.f32 0.5, %v359_v37 }
  0xe2   : > { %v368_v41 = vpop.f32.mrf.mxu0 }
  0xe3   : > { %765 = verf.f32 %v389_v39  ;;  %v392_v42 = vmul.f32 0.70710677, %v374_v40  ;;  %v369_v43 = vadd.f32 %v635_v20, %v368_v41  ;;  %v384_v10 = vmul.f32 0.5, %v374_v40 }
  0xe5   : > { %767 = verf.f32 %v392_v42  ;;  %v391_v44 = vmul.f32 0.70710677, %v369_v43  ;;  %v383_v8 = vmul.f32 0.5, %v369_v43 }
  0xe6   : > { %v756_v45 = vpop.eup %755 }
  0xe7   : > { %769 = verf.f32 %v391_v44  ;;  %v402_v47 = vadd.f32 1.0, %v756_v45 }
  0xe8   : > { %v758_v46 = vpop.eup %757 }
  0xe9   : > { %v401_v49 = vadd.f32 1.0, %v758_v46  ;;  %v410_v54 = vmul.f32 %v402_v47, %v378_v51 }
  0xea   : > { %v760_v50 = vpop.eup %759 }
  0xeb   : > { %v409_v52 = vmul.f32 %v401_v49, %v377_v48  ;;  %v404_v55 = vadd.f32 1.0, %v760_v50 }
  0xec   : > { %v762_v53 = vpop.eup %761 }
  0xed   : > { %719 = vmatprep.mubr.msk.f32.mxu0 %vm432_vm1, %v409_v52  ;;  %v403_v57 = vadd.f32 1.0, %v762_v53  ;;  %v412_v62 = vmul.f32 %v404_v55, %v380_v59 }
  0xee   : > { %v764_v58 = vpop.eup %763  ;;  %720 = vmatmul.mubr.msk.f32.vlgmr.msra.gmra.mxu0 %vm432_vm1, %v410_v54 }
  0xef   : > { %v411_v60 = vmul.f32 %v403_v57, %v379_v56  ;;  %v406_v63 = vadd.f32 1.0, %v764_v58 }
  0xf0   : > { %v766_v61 = vpop.eup %765 }
  0xf1   : > { %v405_v1 = vadd.f32 1.0, %v766_v61  ;;  %722 = vmatprep.mubr.msk.f32.mxu1 %vm432_vm1, %v411_v60  ;;  %v414_v6 = vmul.f32 %v406_v63, %v382_v3 }
  0xf2   : > { %v768_v2 = vpop.eup %767  ;;  %723 = vmatmul.mubr.msk.f32.vlgmr.msra.gmra.mxu1 %vm432_vm1, %v412_v62 }
  0xf3   : > { %v413_v4 = vmul.f32 %v405_v1, %v381_v0  ;;  %v408_v7 = vadd.f32 1.0, %v768_v2 }
  0xf4   : > { %v770_v5 = vpop.eup %769 }
  0xf5   : > { %v407_v9 = vadd.f32 1.0, %v770_v5  ;;  %725 = vmatprep.mubr.msk.f32.mxu1 %vm432_vm1, %v413_v4  ;;  %v416_v12 = vmul.f32 %v408_v7, %v384_v10 }
  0xf6   : > { %726 = vmatmul.mubr.msk.f32.gmra.mxu1 %vm432_vm1, %v414_v6 }
  0xf7   : > { %v415_v11 = vmul.f32 %v407_v9, %v383_v8 }
  0xf9   : > { %728 = vmatprep.mubr.msk.f32.mxu1 %vm432_vm1, %v415_v11 }
  0xfa   : > { %729 = vmatmul.mubr.msk.f32.gmra.mxu1 %vm432_vm1, %v416_v12 }
 0x1ae   : > { %v721_v14 = vpop.f32.mrf.mxu0 }
 0x1af   : > { %v529_v15 = vadd.f32 %v721_v14, %v644_v13 }
 0x1b0   : > { %v523_v16 = vpop.f32.mrf.mxu0 }
 0x1b1   : > { %563 = vst.msk [vmem:[%s226_s8 + $0x8] sm:$0xff] %vm247_vm0, %v529_v15  ;;  %v524_v17 = vadd.f32 %v644_v13, %v523_v16 }
 0x1b2   : > { %v724_v18 = vpop.f32.mrf.mxu1 }
 0x1b3   : > { %562 = vst.msk [vmem:[%s226_s8] sm:$0xff] %vm247_vm0, %v524_v17  ;;  %v539_v19 = vadd.f32 %v724_v18, %v644_v13 }
 0x1b4   : > { %v533_v20 = vpop.f32.mrf.mxu1 }
 0x1b5   : > { %565 = vst.msk [vmem:[%s226_s8 + $0x18] sm:$0xff] %vm247_vm0, %v539_v19  ;;  %v534_v21 = vadd.f32 %v644_v13, %v533_v20 }
 0x1b6   : > { %v727_v22 = vpop.f32.mrf.mxu1 }
 0x1b7   : > { %564 = vst.msk [vmem:[%s226_s8 + $0x10] sm:$0xff] %vm247_vm0, %v534_v21  ;;  %v549_v23 = vadd.f32 %v727_v22, %v644_v13 }
 0x1b8   : > { %v543_v24 = vpop.f32.mrf.mxu1 }
 0x1b9   : > { %567 = vst.msk [vmem:[%s226_s8 + $0x28] sm:$0xff] %vm247_vm0, %v549_v23  ;;  %v544_v25 = vadd.f32 %v644_v13, %v543_v24 }
 0x1ba   : > { %v730_v26 = vpop.f32.mrf.mxu1 }
 0x1bb   : > { %566 = vst.msk [vmem:[%s226_s8 + $0x20] sm:$0xff] %vm247_vm0, %v544_v25  ;;  %v559_v27 = vadd.f32 %v730_v26, %v644_v13 }
 0x1bc   : > { %v553_v28 = vpop.f32.mrf.mxu1 }
 0x1bd   : > { %569 = vst.msk [vmem:[%s226_s8 + $0x38] sm:$0xff] %vm247_vm0, %v559_v27  ;;  %v554_v29 = vadd.f32 %v644_v13, %v553_v28 }
 0x1bf   : > { %568 = vst.msk [vmem:[%s226_s8 + $0x30] sm:$0xff] %vm247_vm0, %v554_v29 }
 0x1c0 PF: > { %s15_s18 = sadd.s32 1, %s777_s18  }
 0x1c1   : > { %p12_p4 = scmp.ge.s32.totalorder %s15_s18, 6  }
 0x1c3   :  { %14 = sbr.rel (!%p12_p4) target bundleno = 1 (0x1), region = 70 }

</bundles_post_ra>
